<compile_context>
chip_gen: v7x
topology: tpu7x:2x2x1
jax: 0.10.0
libtpu: 0.0.40
codegen_flags: <defaults>
</compile_context>

<pallas_src>
import functools

import jax
import jax.numpy as jnp
from jax.experimental import pallas as pl
from jax.experimental.pallas import tpu as pltpu


# --------------------------------------------------------------------------
# Fused Pallas kernel: pose-guider + denoising pointwise path (channels-first)
# --------------------------------------------------------------------------
def fused_net_kernel(pose_ref, x_ref, cond_ref,
                     pg_w1t_ref, pg_b1t_ref, pg_w2t_ref,
                     dn_w1t_ref, dn_w2t_ref, dn_b2t_ref,
                     o_ref):
    # pose_ref:  (1, Cp,  TR) f32   channels-first pose rows (lane-dense)
    # x_ref:     (1, Cin, TR) f32   concat(noisy, scene, occlusion) rows
    # cond_ref:  (1, Hd, 1)   f32   per-batch conditioning (temb/ctx/ref/biases)
    # pg_w1t:    (Hpg, Cp)    f32   pre-transposed weights (w^T @ data form)
    # pg_b1t:    (Hpg, 1)     f32
    # pg_w2t:    (Hd, Hpg)    f32
    # dn_w1t:    (Hd, Cin)    f32
    # dn_w2t:    (Cout, Hd)   f32
    # dn_b2t:    (Cout, 1)    f32
    # o_ref:     (1, Cout, TR) bf16  lane-dense output
    pose = pose_ref[0]                                     # (Cp, TR)
    x = x_ref[0]                                           # (Cin, TR)

    # --- PoseGuider stand-in (conv1x1 -> SiLU -> conv1x1), f32 throughout ---
    ph = jnp.dot(pg_w1t_ref[...], pose,
                 preferred_element_type=jnp.float32)       # (Hpg, TR)
    ph = ph + pg_b1t_ref[...]
    ph = ph * jax.nn.sigmoid(ph)                           # SiLU (v5e-safe f32)
    pose_feat = jnp.dot(pg_w2t_ref[...], ph,
                        preferred_element_type=jnp.float32)  # (Hd, TR)

    # --- Denoising UNet stand-in ---
    h = jnp.dot(dn_w1t_ref[...], x,
                preferred_element_type=jnp.float32)        # (Hd, TR)
    h = h + pose_feat + cond_ref[0]                        # lane-broadcast add
    h = h * jax.nn.sigmoid(h)                              # SiLU in f32

    # Output projection directly in (Cout, TR): lane-dense store, no masking.
    o = jnp.dot(dn_w2t_ref[...], h,
                preferred_element_type=jnp.float32)        # (Cout, TR)
    o_ref[0] = (o + dn_b2t_ref[...]).astype(o_ref.dtype)


def _pick_row_tile(n, b):
    # Lane-dense tiles (multiples of 128) that divide N.  Grow large to
    # amortize the ~0.35us per-grid-step overhead, but keep >= 2 total grid
    # steps so v7x's two TensorCores both get work.
    candidates = [t for t in (32768, 16384, 8192, 4096, 2048, 1024, 512, 256, 128)
                  if n % t == 0]
    if not candidates:
        return n                      # tiny / ragged N: single full tile
    for t in candidates:
        if b * (n // t) >= 2:
            return t
    return candidates[-1]             # e.g. B == 1 and N == 128


def fused_net_call(pose_cf, x_cf, cond,
                   pg_w1t, pg_b1t, pg_w2t, dn_w1t, dn_w2t, dn_b2t):
    B, Cp, N = pose_cf.shape
    Cin = x_cf.shape[1]
    Hd = cond.shape[1]
    Cout = dn_w2t.shape[0]
    tr = _pick_row_tile(N, B)
    grid = (B, N // tr)

    def _rep(shape):
        nd = len(shape)
        return pl.BlockSpec(tuple(shape), lambda b, r, nd=nd: (0,) * nd)

    return pl.pallas_call(
        fused_net_kernel,
        out_shape=jax.ShapeDtypeStruct((B, Cout, N), jnp.bfloat16),
        grid=grid,
        in_specs=[
            pl.BlockSpec((1, Cp, tr), lambda b, r: (b, 0, r)),     # pose (streamed)
            pl.BlockSpec((1, Cin, tr), lambda b, r: (b, 0, r)),    # latents (streamed)
            pl.BlockSpec((1, Hd, 1), lambda b, r: (b, 0, 0)),      # per-batch cond
            _rep(pg_w1t.shape), _rep(pg_b1t.shape), _rep(pg_w2t.shape),
            _rep(dn_w1t.shape), _rep(dn_w2t.shape), _rep(dn_b2t.shape),
        ],
        out_specs=pl.BlockSpec((1, Cout, tr), lambda b, r: (b, 0, r)),
        compiler_params=pltpu.CompilerParams(
            dimension_semantics=("parallel", "parallel")),
    )(pose_cf, x_cf, cond, pg_w1t, pg_b1t, pg_w2t, dn_w1t, dn_w2t, dn_b2t)


# --------------------------------------------------------------------------
# Parameter init (deterministic, synthetic stand-ins)
# --------------------------------------------------------------------------
def init_params(key, *, c_lat=4, c_pose=3, hd=32, hd_pg=16, ht=32, d_clip=32):
    ks = jax.random.split(key, 8)
    s = 0.05
    cin = 3 * c_lat  # noisy_latent ++ scene ++ occlusion
    return dict(
        # PoseGuider stand-in
        pg_w1=s * jax.random.normal(ks[0], (c_pose, hd_pg), jnp.float32),
        pg_b1=jnp.zeros((1, hd_pg), jnp.float32),
        pg_w2=s * jax.random.normal(ks[1], (hd_pg, hd), jnp.float32),
        pg_b2=jnp.zeros((1, hd), jnp.float32),
        # Reference UNet stand-in
        ref_w=s * jax.random.normal(ks[2], (c_lat, hd), jnp.float32),
        ref_b=jnp.zeros((1, hd), jnp.float32),
        # Denoising UNet stand-in
        dn_w1=s * jax.random.normal(ks[3], (cin, hd), jnp.float32),
        dn_b1=jnp.zeros((1, hd), jnp.float32),
        dn_wt=s * jax.random.normal(ks[4], (ht, hd), jnp.float32),
        dn_wctx=s * jax.random.normal(ks[5], (d_clip, hd), jnp.float32),
        dn_w2=s * jax.random.normal(ks[6], (hd, c_lat), jnp.float32),
        dn_b2=jnp.zeros((1, c_lat), jnp.float32),
    )


def sinusoidal_timestep_embedding(t, dim):
    # `dim` is a static Python int (derived from a weight shape), never a tracer.
    half = dim // 2
    freqs = jnp.exp(-jnp.log(10000.0) * jnp.arange(half, dtype=jnp.float32) / half)
    args = t.astype(jnp.float32)[:, None] * freqs[None, :]
    return jnp.concatenate([jnp.cos(args), jnp.sin(args)], axis=-1)   # (B, dim)


# --------------------------------------------------------------------------
# Net.forward equivalent
# --------------------------------------------------------------------------
@functools.partial(jax.jit, static_argnames=("uncond_fwd",))
def net_forward(params, noisy_latent_video, timesteps, latent_apose, a_pose_clip,
                rast_2d_joints, latents_scene, latents_occlusion, uncond_fwd=False):
    B, c_lat, F, H, W = noisy_latent_video.shape
    hd = params["dn_w2"].shape[0]          # static (from weight shape)
    ht = params["dn_wt"].shape[0]          # static (from weight shape)
    N = F * H * W

    # rast_2d_joints.transpose(1, 2): (B, F, Cp, H, W) -> (B, Cp, F, H, W);
    # then a pure reshape to channels-first rows (B, Cp, N) — no channels-last
    # transpose pass over HBM.
    rast = jnp.swapaxes(rast_2d_joints, 1, 2)
    pose_cf = rast.reshape(B, rast.shape[1], N)                      # f32

    # --- per-batch conditioning (tiny matmuls: computed outside the kernel) ---
    temb = sinusoidal_timestep_embedding(timesteps, ht)              # (B, Ht)
    temb_proj = temb @ params["dn_wt"]                               # (B, Hd)

    if not uncond_fwd:
        # ref_timesteps = zeros_like(timesteps): reference branch unconditioned on t.
        encoder_hidden_states = a_pose_clip[:, None, :]              # unsqueeze(1)
        apose_rows = jnp.transpose(latent_apose, (0, 2, 3, 1)).reshape(B, H * W, c_lat)
        ref_h = apose_rows @ params["ref_w"] + params["ref_b"]
        ref_h = ref_h * jax.nn.sigmoid(ref_h)
        ref_feat = jnp.mean(ref_h, axis=1)                           # (B, Hd)
        # TODO(synk): reference_control_writer/reader cross-attention feature-bank
        # injection is reduced to a pooled per-batch reference feature.
    else:
        encoder_hidden_states = jnp.zeros_like(a_pose_clip)[:, None, :]
        ref_feat = jnp.zeros((B, hd), jnp.float32)

    ctx_proj = encoder_hidden_states[:, 0, :] @ params["dn_wctx"]    # (B, Hd)
    cond = (temb_proj + ctx_proj + ref_feat
            + params["dn_b1"] + params["pg_b2"])[:, :, None]         # (B, Hd, 1) f32

    # latents_scene / latents_occlusion .transpose(1, 2): (B,F,C,H,W)->(B,C,F,H,W)
    scene = jnp.swapaxes(latents_scene, 1, 2)
    occl = jnp.swapaxes(latents_occlusion, 1, 2)
    x = jnp.concatenate([noisy_latent_video, scene, occl], axis=1)   # (B, 3*C, F, H, W)
    x_cf = x.reshape(B, 3 * c_lat, N)                                # f32, reshape only

    # Pre-transposed f32 weights (w^T @ data orientation inside the kernel).
    pg_w1t = params["pg_w1"].T                                       # (Hpg, Cp)
    pg_b1t = params["pg_b1"].T                                       # (Hpg, 1)
    pg_w2t = params["pg_w2"].T                                       # (Hd, Hpg)
    dn_w1t = params["dn_w1"].T                                       # (Hd, Cin)
    dn_w2t = params["dn_w2"].T                                       # (Cout, Hd)
    dn_b2t = params["dn_b2"].T                                       # (Cout, 1)

    out_t = fused_net_call(pose_cf, x_cf, cond,
                           pg_w1t, pg_b1t, pg_w2t,
                           dn_w1t, dn_w2t, dn_b2t)                   # (B, Cout, N) bf16

    # back to PyTorch video layout (B, C, F, H, W) — pure reshape, no transpose.
    model_pred = out_t.reshape(B, c_lat, F, H, W)
    return model_pred


# --------------------------------------------------------------------------
# Main
# --------------------------------------------------------------------------
if __name__ == "__main__":
    B, C_LAT, F, H, W = 2, 4, 2, 8, 8
    C_POSE, D_CLIP = 3, 32

    key = jax.random.PRNGKey(0)
    kp, k1, k2, k3, k4, k5, k6 = jax.random.split(key, 7)

    params = init_params(kp, c_lat=C_LAT, c_pose=C_POSE, d_clip=D_CLIP)

    noisy_latent_video = jax.random.normal(k1, (B, C_LAT, F, H, W), jnp.float32)
    timesteps = jnp.array([10, 500], dtype=jnp.int32)
    latent_apose = jax.random.normal(k2, (B, C_LAT, H, W), jnp.float32)
    a_pose_clip = jax.random.normal(k3, (B, D_CLIP), jnp.float32)
    rast_2d_joints = jax.random.normal(k4, (B, F, C_POSE, H, W), jnp.float32)
    latents_scene = jax.random.normal(k5, (B, F, C_LAT, H, W), jnp.float32)
    latents_occlusion = jax.random.normal(k6, (B, F, C_LAT, H, W), jnp.float32)

    out = net_forward(params, noisy_latent_video, timesteps, latent_apose, a_pose_clip,
                      rast_2d_joints, latents_scene, latents_occlusion, uncond_fwd=False)
    jax.block_until_ready(out)
    assert out.shape == (B, C_LAT, F, H, W), out.shape

    # also exercise the uncond branch
    out_uc = net_forward(params, noisy_latent_video, timesteps, latent_apose, a_pose_clip,
                         rast_2d_joints, latents_scene, latents_occlusion, uncond_fwd=True)
    jax.block_until_ready(out_uc)
    assert out_uc.shape == (B, C_LAT, F, H, W)

    print("KERNEL_OK")
</pallas_src>

<mosaic_0001>
module attributes {stable_mosaic.version = 11 : i64} {
  func.func @fused_net_kernel(%arg0: i32, %arg1: i32, %arg2: memref<1x3x128xf32, #tpu.memory_space<vmem>>, %arg3: memref<1x12x128xf32, #tpu.memory_space<vmem>>, %arg4: memref<1x32x1xf32, #tpu.memory_space<vmem>>, %arg5: memref<16x3xf32, #tpu.memory_space<vmem>>, %arg6: memref<16x1xf32, #tpu.memory_space<vmem>>, %arg7: memref<32x16xf32, #tpu.memory_space<vmem>>, %arg8: memref<32x12xf32, #tpu.memory_space<vmem>>, %arg9: memref<4x32xf32, #tpu.memory_space<vmem>>, %arg10: memref<4x1xf32, #tpu.memory_space<vmem>>, %arg11: memref<1x4x128xbf16, #tpu.memory_space<vmem>>) attributes {dimension_semantics = [#tpu.dimension_semantics<parallel>, #tpu.dimension_semantics<parallel>], iteration_bounds = array<i64: 2, 1>, scalar_prefetch = 0 : i64, scratch_operands = 0 : i64, tpu.core_type = #tpu.core_type<tc>, window_params = [{transform_indices = @transform_0, window_bounds = array<i64: 1, 3, 128>}, {transform_indices = @transform_1, window_bounds = array<i64: 1, 12, 128>}, {transform_indices = @transform_2, window_bounds = array<i64: 1, 32, 1>}, {pipeline_mode = #tpu.pipeline_mode<synchronous>, transform_indices = @transform_3, window_bounds = array<i64: 16, 3>}, {pipeline_mode = #tpu.pipeline_mode<synchronous>, transform_indices = @transform_4, window_bounds = array<i64: 16, 1>}, {pipeline_mode = #tpu.pipeline_mode<synchronous>, transform_indices = @transform_5, window_bounds = array<i64: 32, 16>}, {pipeline_mode = #tpu.pipeline_mode<synchronous>, transform_indices = @transform_6, window_bounds = array<i64: 32, 12>}, {pipeline_mode = #tpu.pipeline_mode<synchronous>, transform_indices = @transform_7, window_bounds = array<i64: 4, 32>}, {pipeline_mode = #tpu.pipeline_mode<synchronous>, transform_indices = @transform_8, window_bounds = array<i64: 4, 1>}, {transform_indices = @transform_9, window_bounds = array<i64: 1, 4, 128>}]} {
    %c0 = arith.constant 0 : index
    %c0_0 = arith.constant 0 : index
    %c0_1 = arith.constant 0 : index
    %0 = vector.load %arg2[%c0, %c0_0, %c0_1] : memref<1x3x128xf32, #tpu.memory_space<vmem>>, vector<1x3x128xf32>
    %1 = vector.shape_cast %0 : vector<1x3x128xf32> to vector<3x128xf32>
    %c0_2 = arith.constant 0 : index
    %c0_3 = arith.constant 0 : index
    %c0_4 = arith.constant 0 : index
    %2 = vector.load %arg3[%c0_2, %c0_3, %c0_4] : memref<1x12x128xf32, #tpu.memory_space<vmem>>, vector<1x12x128xf32>
    %3 = vector.shape_cast %2 : vector<1x12x128xf32> to vector<12x128xf32>
    %c0_5 = arith.constant 0 : index
    %c0_6 = arith.constant 0 : index
    %4 = vector.load %arg5[%c0_5, %c0_6] : memref<16x3xf32, #tpu.memory_space<vmem>>, vector<16x3xf32>
    %cst = arith.constant dense<0.000000e+00> : vector<16x128xf32>
    %5 = tpu.matmul %4, %1, %cst {dimension_numbers = #tpu.dot_dimension_numbers<[1], [0], [0], [1], [0, 0, 1, 1], [], []>} : vector<16x3xf32>, vector<3x128xf32>, vector<16x128xf32> -> vector<16x128xf32>
    %c0_7 = arith.constant 0 : index
    %c0_8 = arith.constant 0 : index
    %6 = vector.load %arg6[%c0_7, %c0_8] : memref<16x1xf32, #tpu.memory_space<vmem>>, vector<16x1xf32>
    %7 = vector.broadcast %6 : vector<16x1xf32> to vector<16x128xf32>
    %8 = arith.addf %5, %7 : vector<16x128xf32>
    %9 = arith.negf %8 : vector<16x128xf32>
    %10 = math.exp %9 : vector<16x128xf32>
    %cst_9 = arith.constant 1.000000e+00 : f32
    %11 = vector.broadcast %cst_9 : f32 to vector<16x128xf32>
    %12 = arith.addf %11, %10 : vector<16x128xf32>
    %13 = arith.divf %11, %12 : vector<16x128xf32>
    %14 = arith.mulf %8, %13 : vector<16x128xf32>
    %c0_10 = arith.constant 0 : index
    %c0_11 = arith.constant 0 : index
    %15 = vector.load %arg7[%c0_10, %c0_11] : memref<32x16xf32, #tpu.memory_space<vmem>>, vector<32x16xf32>
    %cst_12 = arith.constant dense<0.000000e+00> : vector<32x128xf32>
    %16 = tpu.matmul %15, %14, %cst_12 {dimension_numbers = #tpu.dot_dimension_numbers<[1], [0], [0], [1], [0, 0, 1, 1], [], []>} : vector<32x16xf32>, vector<16x128xf32>, vector<32x128xf32> -> vector<32x128xf32>
    %c0_13 = arith.constant 0 : index
    %c0_14 = arith.constant 0 : index
    %17 = vector.load %arg8[%c0_13, %c0_14] : memref<32x12xf32, #tpu.memory_space<vmem>>, vector<32x12xf32>
    %cst_15 = arith.constant dense<0.000000e+00> : vector<32x128xf32>
    %18 = tpu.matmul %17, %3, %cst_15 {dimension_numbers = #tpu.dot_dimension_numbers<[1], [0], [0], [1], [0, 0, 1, 1], [], []>} : vector<32x12xf32>, vector<12x128xf32>, vector<32x128xf32> -> vector<32x128xf32>
    %19 = arith.addf %18, %16 : vector<32x128xf32>
    %c0_16 = arith.constant 0 : index
    %c0_17 = arith.constant 0 : index
    %c0_18 = arith.constant 0 : index
    %20 = vector.load %arg4[%c0_16, %c0_17, %c0_18] : memref<1x32x1xf32, #tpu.memory_space<vmem>>, vector<1x32x1xf32>
    %21 = vector.shape_cast %20 : vector<1x32x1xf32> to vector<32x1xf32>
    %22 = vector.broadcast %21 : vector<32x1xf32> to vector<32x128xf32>
    %23 = arith.addf %19, %22 : vector<32x128xf32>
    %24 = arith.negf %23 : vector<32x128xf32>
    %25 = math.exp %24 : vector<32x128xf32>
    %cst_19 = arith.constant 1.000000e+00 : f32
    %26 = vector.broadcast %cst_19 : f32 to vector<32x128xf32>
    %27 = arith.addf %26, %25 : vector<32x128xf32>
    %28 = arith.divf %26, %27 : vector<32x128xf32>
    %29 = arith.mulf %23, %28 : vector<32x128xf32>
    %c0_20 = arith.constant 0 : index
    %c0_21 = arith.constant 0 : index
    %30 = vector.load %arg9[%c0_20, %c0_21] : memref<4x32xf32, #tpu.memory_space<vmem>>, vector<4x32xf32>
    %cst_22 = arith.constant dense<0.000000e+00> : vector<4x128xf32>
    %31 = tpu.matmul %30, %29, %cst_22 {dimension_numbers = #tpu.dot_dimension_numbers<[1], [0], [0], [1], [0, 0, 1, 1], [], []>} : vector<4x32xf32>, vector<32x128xf32>, vector<4x128xf32> -> vector<4x128xf32>
    %c0_23 = arith.constant 0 : index
    %c0_24 = arith.constant 0 : index
    %32 = vector.load %arg10[%c0_23, %c0_24] : memref<4x1xf32, #tpu.memory_space<vmem>>, vector<4x1xf32>
    %33 = vector.broadcast %32 : vector<4x1xf32> to vector<4x128xf32>
    %34 = arith.addf %31, %33 : vector<4x128xf32>
    %35 = arith.truncf %34 : vector<4x128xf32> to vector<4x128xbf16>
    %c0_25 = arith.constant 0 : index
    %c0_26 = arith.constant 0 : index
    %c0_27 = arith.constant 0 : index
    %36 = vector.load %arg11[%c0_25, %c0_26, %c0_27] : memref<1x4x128xbf16, #tpu.memory_space<vmem>>, vector<1x4x128xbf16>
    %37 = vector.shape_cast %36 : vector<1x4x128xbf16> to vector<4x128xbf16>
    %38 = vector.shape_cast %35 : vector<4x128xbf16> to vector<1x4x128xbf16>
    tpu.vector_store %arg11[%c0_25, %c0_26, %c0_27], %38 {strides = array<i32>} : memref<1x4x128xbf16, #tpu.memory_space<vmem>>, vector<1x4x128xbf16>,
    return
  }
  func.func @transform_0(%arg0: i32, %arg1: i32) -> (i32, i32, i32) {
    %c0_i32 = arith.constant 0 : i32
    %c0_i32_0 = arith.constant 0 : i32
    return %arg0, %c0_i32, %arg1 : i32, i32, i32
  }
  func.func @transform_1(%arg0: i32, %arg1: i32) -> (i32, i32, i32) {
    %c0_i32 = arith.constant 0 : i32
    %c0_i32_0 = arith.constant 0 : i32
    return %arg0, %c0_i32, %arg1 : i32, i32, i32
  }
  func.func @transform_2(%arg0: i32, %arg1: i32) -> (i32, i32, i32) {
    %c0_i32 = arith.constant 0 : i32
    %c0_i32_0 = arith.constant 0 : i32
    %c0_i32_1 = arith.constant 0 : i32
    return %arg0, %c0_i32, %c0_i32_0 : i32, i32, i32
  }
  func.func @transform_3(%arg0: i32, %arg1: i32) -> (i32, i32) {
    %c0_i32 = arith.constant 0 : i32
    %c0_i32_0 = arith.constant 0 : i32
    %c0_i32_1 = arith.constant 0 : i32
    return %c0_i32, %c0_i32_0 : i32, i32
  }
  func.func @transform_4(%arg0: i32, %arg1: i32) -> (i32, i32) {
    %c0_i32 = arith.constant 0 : i32
    %c0_i32_0 = arith.constant 0 : i32
    %c0_i32_1 = arith.constant 0 : i32
    return %c0_i32, %c0_i32_0 : i32, i32
  }
  func.func @transform_5(%arg0: i32, %arg1: i32) -> (i32, i32) {
    %c0_i32 = arith.constant 0 : i32
    %c0_i32_0 = arith.constant 0 : i32
    %c0_i32_1 = arith.constant 0 : i32
    return %c0_i32, %c0_i32_0 : i32, i32
  }
  func.func @transform_6(%arg0: i32, %arg1: i32) -> (i32, i32) {
    %c0_i32 = arith.constant 0 : i32
    %c0_i32_0 = arith.constant 0 : i32
    %c0_i32_1 = arith.constant 0 : i32
    return %c0_i32, %c0_i32_0 : i32, i32
  }
  func.func @transform_7(%arg0: i32, %arg1: i32) -> (i32, i32) {
    %c0_i32 = arith.constant 0 : i32
    %c0_i32_0 = arith.constant 0 : i32
    %c0_i32_1 = arith.constant 0 : i32
    return %c0_i32, %c0_i32_0 : i32, i32
  }
  func.func @transform_8(%arg0: i32, %arg1: i32) -> (i32, i32) {
    %c0_i32 = arith.constant 0 : i32
    %c0_i32_0 = arith.constant 0 : i32
    %c0_i32_1 = arith.constant 0 : i32
    return %c0_i32, %c0_i32_0 : i32, i32
  }
  func.func @transform_9(%arg0: i32, %arg1: i32) -> (i32, i32, i32) {
    %c0_i32 = arith.constant 0 : i32
    %c0_i32_0 = arith.constant 0 : i32
    return %arg0, %c0_i32, %arg1 : i32, i32, i32
  }
}

</mosaic_0001>

<bundles_post_ra>
// kernel: net_forward.1
= control target key start
LH: loop header
LB: loop body
LE: loop exit
PB: predicated region body
PF: predicated region fallthrough
CT: control target
= control target key end

     0   :  { %s1222_s30 = smov 0   ;;  %s1224_s10 = smov 0   ;;  %s1321_s0 = inlined_call_operand.vmem [shape: f32[2,3,128], index: 0, kind: input, shape index: {}]   ;;  %s1322_s1 = inlined_call_operand.vmem [shape: f32[2,12,128], index: 1, kind: input, shape index: {}]   ;;  %s1323_s2 = inlined_call_operand.vmem [shape: f32[2,32,1], index: 2, kind: input, shape index: {}]   ;;  %s1324_s3 = inlined_call_operand.vmem [shape: f32[16,3], index: 3, kind: input, shape index: {}]   ;;  %s1325_s4 = inlined_call_operand.vmem [shape: f32[16,1], index: 4, kind: input, shape index: {}]   ;;  %s1326_s5 = inlined_call_operand.vmem [shape: f32[32,16], index: 5, kind: input, shape index: {}]   ;;  %s1327_s6 = inlined_call_operand.vmem [shape: f32[32,12], index: 6, kind: input, shape index: {}]   ;;  %s1328_s7 = inlined_call_operand.vmem [shape: f32[4,32], index: 7, kind: input, shape index: {}]   ;;  %s1329_s8 = inlined_call_operand.vmem [shape: f32[4,1], index: 8, kind: input, shape index: {}]   ;;  %s1330_s9 = inlined_call_operand.vmem [shape: bf16[2,4,128], index: 9, kind: output, shape index: {}]  }
   0x1   :  { %s1226_s11 = smov 0  }
   0x2 LB: > { %s31_s12 = sadd.s32 1, %s1161_s10  ;;  %p982_p0 = scmp.ge.s32.totalorder %s1165_s11, 1  ;;  %s1165_s11 = sphi %s1226_s11, %s19_s11   ;;  %s1161_s10 = sphi %s1224_s10, %s1332_s10   ;;  %s1157_s30 = sphi %s1222_s30, %s1331_s30  }
   0x3   : > { %p33_p1 = scmp.ge.s32.totalorder %s31_s12, 2  ;;  %p330_p2 = scmp.lt.s32.totalorder %s1165_s11, 3 }
   0x5   : > { %s1334_s12 = smov (%p33_p1, %s31_s12), 0  ;;  %p331_p3 = pnand %p982_p0, %p330_p2 }
   0x6   : > { %p383_p4 = scmp.lt.s32.totalorder (!%p331_p3), %s1157_s30, 1  ;;  %v413_v0 = vld [vmem:[%s1324_s3] sm:$0xff] (!%p331_p3)  ;;  %vm427_vm0 = vcmask (!%p331_p3), 23552   ;;  %v1167_v1 = vmov (!%p331_p3), 0   ;;  %v416_v3 = vld [vmem:[%s1325_s4 + $0x8] sm:$0xff] (!%p331_p3)  ;;  %vm434_vm1 = vcmask (!%p331_p3), 1042432  }
   0x7   : > { %334 = sbr.rel (%p331_p3) target bundleno = 740 (0x2e4), region = 56  ;;  %1034 = vmatprep.mubr.msk.f32.mxu1 (!%p331_p3), %vm427_vm0, %v413_v0  ;;  %1117 = vset.pattern.permute.xlu0 (!%p331_p3), %v1167_v1  ;;  %v415_v2 = vld [vmem:[%s1325_s4] sm:$0xff] (!%p331_p3)  ;;  %v414_v5 = vld [vmem:[%s1324_s3 + $0x8] sm:$0xff] (!%p331_p3)  ;;  %vm646_vm2 = vcmask (!%p331_p3), 1043456   ;;  %vm1168_vm3 = vmmov (!%p331_p3), 1   ;;  %vm633_vm5 = vcmask (!%p331_p3), 97280  }
   0x8   : > { %419 = vperm.xlu0 (!%p331_p3), %1117, %v415_v2   ;;  %1118 = vset.pattern.permute.xlu1 (!%p331_p3), %v1167_v1  ;;  %v792_v7 = vld [vmem:[%s1329_s8] sm:$0xf] (!%p331_p3)  ;;  %vm1073_vm4 = vmpackc.low (!%p331_p3), %vm646_vm2, %vm1168_vm3  ;;  %vm531_vm6 = vcmask (!%p331_p3), 130048   ;;  %v630_v13 = vld [vmem:[%s1327_s6 + $0x8] sm:$0xff] (!%p331_p3)  ;;  %v1169_v43 = vmov (!%p331_p3), 0.0|0.0   ;;  %vm1170_vm7 = vmmov (!%p331_p3), 0  }
   0x9   : > { %v629_v11 = vld [vmem:[%s1327_s6] sm:$0xff] (!%p331_p3)  ;;  %v631_v14 = vld [vmem:[%s1327_s6 + $0x10] sm:$0xff] (!%p331_p3)  ;;  %v632_v15 = vld [vmem:[%s1327_s6 + $0x18] sm:$0xff] (!%p331_p3)  ;;  %v1171_v44 = vmov (!%p331_p3), 0.0   ;;  %vm798_vm8 = vcmask (!%p331_p3), 261120  }
   0xa   : > { %v527_v12 = vld [vmem:[%s1326_s5] sm:$0xff] (!%p331_p3)  ;;  %v528_v36 = vld [vmem:[%s1326_s5 + $0x8] sm:$0xff] (!%p331_p3)  ;;  %v529_v37 = vld [vmem:[%s1326_s5 + $0x10] sm:$0xff] (!%p331_p3) }
   0xb   : > { %1041 = vmatprep.mubr.msk.f32.mxu0 (!%p331_p3), %vm531_vm6, %v527_v12  ;;  %v530_v38 = vld [vmem:[%s1326_s5 + $0x18] sm:$0xff] (!%p331_p3) }
   0xc   : > { %424 = vperm.xlu0 (!%p331_p3), %1117, %v416_v3  }
   0xe   : > { %s1336_s30 = smov (!%p383_p4, %s1157_s30), 1 }
   0xf   : > { %s983_s19 = sshll.u32 %s1336_s30, 2  ;;  %s1011_s20 = sshll.u32 %s1336_s30, 5 }
  0x10   : > { %s389_s23 = scalar_lea.vmem %s1321_s0, %s983_s19  ;;  %s1260_s26 = scalar_lea.vmem %s1323_s2, %s1011_s20 }
  0x11   : > { %v410_v4 = vld [vmem:[%s389_s23] sm:$0x7]  ;;  %v737_v6 = vld [vmem:[%s1260_s26 + $0x10] sm:$0xff]  ;;  %s1010_s14 = sshll.u32 %s1336_s30, 4  ;;  %v736_v17 = vld [vmem:[%s1260_s26 + $0x8] sm:$0xff]  ;;  %s988_s19 = sshll.u32 %s1336_s30, 1 }
  0x12   : > { %1032 = vmatprep.subr.msk.mxu1 %vm434_vm1, %v410_v4  ;;  %751 = vperm.xlu0 %1117, %v737_v6   ;;  %s397_s17 = scalar_lea.vmem %s1322_s1, %s1010_s14  ;;  %v735_v16 = vld [vmem:[%s1260_s26] sm:$0xff]  ;;  %v738_v18 = vld [vmem:[%s1260_s26 + $0x18] sm:$0xff]  ;;  %s409_s22 = scalar_lea.vmem %s1330_s9, %s988_s19 }
  0x13   : > { %1033 = vmatpush3.msk.msra.mxu1 %vm434_vm1, %v410_v4  ;;  %v411_v8 = vld [vmem:[%s397_s17] sm:$0xff]  ;;  %v412_v9 = vld [vmem:[%s397_s17 + $0x8] sm:$0xf]  ;;  %741 = vperm.xlu1 %1118, %v735_v16  }
  0x14   : > { %1035 = vmatmul.mubr.msk.f32.vlgmr.msra.gmra.mrb[0].mxu1 %vm427_vm0, %v414_v5  ;;  %v1072_v10 = vpack.c.bf16 %v412_v9, %v411_v8 }
  0x15   : > { %1051 = vmatprep.mubr.msk.f32.mxu1 %vm633_vm5, %v629_v11 }
  0x16   : > { %795 = vperm.xlu0 %1117, %v792_v7   ;;  %1074 = vmatprep.subr.msk.bf16.mxu1 %vm1073_vm4, %v1072_v10 }
  0x17   : > { %1077 = vmatpush3.bf16.msk.msra.mxu1 %vm1073_vm4, %v1072_v10  ;;  %746 = vperm.xlu1 %1118, %v736_v17  }
  0x1a   : > { %1052 = vmatmul.mubr.msk.f32.vlgmr.msra.gmra.mrb[2].mxu1 %vm633_vm5, %v630_v13 }
  0x1b   : > { %1054 = vmatprep.mubr.msk.f32.mxu1 %vm633_vm5, %v631_v14  ;;  %756 = vperm.xlu1 %1118, %v738_v18  }
  0x1e   : > { %1055 = vmatmul.mubr.msk.f32.gmra.mrb[4].mxu1 %vm633_vm5, %v632_v15 }
  0x87   : > { %v420_v19 = vpop.permute.xlu0 %419 }
  0x8b   : > { %v425_v20 = vpop.permute.xlu0 %424 }
  0x91   : > { %v752_v60 = vpop.permute.xlu0 %751 }
  0x92   : > { %v742_v45 = vpop.permute.xlu1 %741 }
  0x96   : > { %v747_v46 = vpop.permute.xlu1 %746 }
  0x9a   : > { %v757_v57 = vpop.permute.xlu1 %756 }
  0xe7   : > { %v1036_v21 = vpop.f32.mrb[0].mxu1 }
  0xe8   : > { %v510_v22 = vadd.f32 %v1036_v21, %v425_v20  ;;  %v504_v23 = vpop.f32.mrb[1].mxu1  ;;  %v796_v20 = vpop.permute.xlu0 %795 }
  0xe9   : > { %v505_v24 = vadd.f32 %v504_v23, %v420_v19  ;;  %v791_v19 = vld [vmem:[%s1328_s7] sm:$0xf] }
  0xea   : > { %v993_v25 = vmul.f32 -1.442695, %v510_v22 }
  0xeb   : > { %v992_v26 = vmul.f32 -1.442695, %v505_v24 }
  0xec   : > { %1119 = vpow2.f32 %v993_v25 }
  0xed   : > { %1121 = vpow2.f32 %v992_v26  ;;  %v1053_v39 = vpop.f32.mrb[2].mxu1 }
  0xee   : > { %v716_v40 = vpop.f32.mrb[3].mxu1 }
  0xf1   : > { %v1056_v41 = vpop.f32.mrb[4].mxu1 }
  0xf2   : > { %v726_v42 = vpop.f32.mrb[5].mxu1 }
  0xf6   : > { %v1120_v27 = vpop.eup %1119 }
  0xf7   : > { %v1122_v28 = vpop.eup %1121  ;;  %v520_v29 = vadd.f32 1.0, %v1120_v27 }
  0xf8   : > { %v519_v30 = vadd.f32 1.0, %v1122_v28 }
  0xf9   : > { %1123 = vrcp.f32 %v520_v29 }
  0xfa   : > { %1125 = vrcp.f32 %v519_v30 }
 0x103   : > { %v1124_v31 = vpop.eup %1123 }
 0x104   : > { %v1126_v32 = vpop.eup %1125  ;;  %v526_v33 = vmul.f32 %v1124_v31, %v510_v22 }
 0x105   : > { %v525_v34 = vmul.f32 %v1126_v32, %v505_v24 }
 0x107   : > { %v1068_v35 = vpack.c.bf16 %v526_v33, %v525_v34 }
 0x109   : > { %1069 = vmatprep.subr.bf16.mxu0 %v1068_v35 }
 0x10a   : > { %1071 = vmatpush3.bf16.msra.mxu0 %v1068_v35 }
 0x10b   : > { %1078 = vmatprep.subr.bf16.mxu0 %v1169_v43 }
 0x10d   : > { %1042 = vmatmul.mubr.msk.f32.vlgmr.msra.gmra.mrb[0].mxu0 %vm531_vm6, %v528_v36 }
 0x10e   : > { %1044 = vmatprep.mubr.msk.f32.mxu0 %vm531_vm6, %v529_v37 }
 0x111   : > { %1045 = vmatmul.mubr.msk.f32.gmra.mrb[2].mxu0 %vm531_vm6, %v530_v38 }
 0x112   : > { %1065 = vmatprep.mubr.msk.f32.mxu0 %vm1170_vm7, %v1171_v44 }
 0x1e0   : > { %v1043_v47 = vpop.f32.mrb[0].mxu0 }
 0x1e1   : > { %v722_v48 = vadd.f32 %v1053_v39, %v1043_v47  ;;  %v610_v49 = vpop.f32.mrb[1].mxu0 }
 0x1e2   : > { %v717_v50 = vadd.f32 %v716_v40, %v610_v49 }
 0x1e3   : > { %v760_v51 = vadd.f32 %v747_v46, %v722_v48 }
 0x1e4   : > { %v759_v52 = vadd.f32 %v742_v45, %v717_v50  ;;  %v1046_v53 = vpop.f32.mrb[2].mxu0 }
 0x1e5   : > { %v1004_v54 = vmul.f32 -1.442695, %v760_v51  ;;  %v732_v55 = vadd.f32 %v1056_v41, %v1046_v53  ;;  %v620_v56 = vpop.f32.mrb[3].mxu0 }
 0x1e6   : > { %v1003_v58 = vmul.f32 -1.442695, %v759_v52  ;;  %v727_v59 = vadd.f32 %v726_v42, %v620_v56 }
 0x1e7   : > { %1127 = vpow2.f32 %v1004_v54  ;;  %v762_v61 = vadd.f32 %v757_v57, %v732_v55 }
 0x1e8   : > { %1129 = vpow2.f32 %v1003_v58  ;;  %v761_v62 = vadd.f32 %v752_v60, %v727_v59 }
 0x1e9   : > { %v1006_v63 = vmul.f32 -1.442695, %v762_v61 }
 0x1ea   : > { %v1005_v0 = vmul.f32 -1.442695, %v761_v62 }
 0x1eb   : > { %1131 = vpow2.f32 %v1006_v63 }
 0x1ec   : > { %1133 = vpow2.f32 %v1005_v0 }
 0x1f1   : > { %v1128_v1 = vpop.eup %1127 }
 0x1f2   : > { %v1130_v2 = vpop.eup %1129  ;;  %v776_v3 = vadd.f32 1.0, %v1128_v1 }
 0x1f3   : > { %v775_v4 = vadd.f32 1.0, %v1130_v2 }
 0x1f4   : > { %1135 = vrcp.f32 %v776_v3 }
 0x1f5   : > { %v1132_v5 = vpop.eup %1131  ;;  %1137 = vrcp.f32 %v775_v4 }
 0x1f6   : > { %v1134_v6 = vpop.eup %1133  ;;  %v778_v7 = vadd.f32 1.0, %v1132_v5 }
 0x1f7   : > { %v777_v8 = vadd.f32 1.0, %v1134_v6 }
 0x1f8   : > { %1139 = vrcp.f32 %v778_v7 }
 0x1f9   : > { %1141 = vrcp.f32 %v777_v8 }
 0x1fe   : > { %v1136_v9 = vpop.eup %1135 }
 0x1ff   : > { %v1138_v10 = vpop.eup %1137  ;;  %v788_v11 = vmul.f32 %v1136_v9, %v760_v51 }
 0x200   : > { %v787_v12 = vmul.f32 %v1138_v10, %v759_v52 }
 0x202   : > { %v1140_v13 = vpop.eup %1139  ;;  %v1079_v14 = vpack.c.bf16 %v788_v11, %v787_v12 }
 0x203   : > { %v1142_v15 = vpop.eup %1141  ;;  %v790_v16 = vmul.f32 %v1140_v13, %v762_v61 }
 0x204   : > { %v789_v17 = vmul.f32 %v1142_v15, %v761_v62  ;;  %1080 = vmatpush3.bf16.msra.mxu0 %v1079_v14 }
 0x205   : > { %1081 = vmatprep.subr.bf16.mxu0 %v1169_v43 }
 0x206   : > { %v1082_v18 = vpack.c.bf16 %v790_v16, %v789_v17 }
 0x208   : > { %1083 = vmatpush3.bf16.msra.mxu0 %v1082_v18 }
 0x20b   : > { %1066 = vmatmul.mubr.msk.f32.vlgmr.msra.gmra.mrb[4].mxu0 %vm798_vm8, %v791_v19 }
 0x2de   : > { %v868_v21 = vpop.f32.mrb[4].mxu0 }
 0x2df   : > { %v869_v22 = vadd.f32 %v868_v21, %v796_v20  ;;  %v1067_v23 = vpop.f32.mrb[5].mxu0 }
 0x2e1   : > { %v872_v24 = vpack.c.bf16 %v869_v22, %v869_v22 }
 0x2e3   : > { %873 = vst [vmem:[%s409_s22] sm:$0x3] %v872_v24 }
 0x2e4 PF: > { %s19_s11 = sadd.s32 1, %s1165_s11   ;;  %s1331_s30 = smov %s1161_s10 }
 0x2e5   : > { %p16_p5 = scmp.ge.s32.totalorder %s19_s11, 4   ;;  %s1332_s10 = smov %s1334_s12 }
 0x2e7   :  { %18 = sbr.rel (!%p16_p5) target bundleno = 2 (0x2), region = 92 }

</bundles_post_ra>
